<compile_context>
chip_gen: v6e
topology: v6e:2x2x1
jax: 0.10.0
libtpu: 0.0.40
codegen_flags: <defaults>
</compile_context>

<pallas_src>
import math

import jax
import jax.numpy as jnp
from jax.experimental import pallas as pl
from jax.experimental.pallas import tpu as pltpu

NEG_SLOPE = 0.01   # F.leaky_relu default negative_slope
_SMALL_N = 1024    # below this, use the single fused VMEM-resident kernel


def _leaky_relu(x):
    return jnp.where(x > 0, x, NEG_SLOPE * x)


def _round_up(x, m):
    return ((x + m - 1) // m) * m


# ---------------------------------------------------------------------------
# Fused single-block kernel (small graphs: whole problem fits easily in VMEM)
# ---------------------------------------------------------------------------
def _gcn_fused_kernel(a_ref, x_ref,
                      w1_ref, b1_ref, w2_ref, b2_ref, w3_ref, b3_ref,
                      o_ref):
    a = a_ref[...]                                           # (N, N) bf16

    # conv1: (A @ X) @ W1   (aggregate first: F_in=3 < F_out=8)
    h = jnp.dot(a, x_ref[...].astype(jnp.bfloat16),
                preferred_element_type=jnp.float32)
    h = jnp.dot(h, w1_ref[...], preferred_element_type=jnp.float32) + b1_ref[...]
    h = _leaky_relu(h)

    # conv2: A @ (H @ W2)   (transform first: F_out=3 < F_in=8)
    s = jnp.dot(h, w2_ref[...], preferred_element_type=jnp.float32)
    h = jnp.dot(a, s.astype(jnp.bfloat16),
                preferred_element_type=jnp.float32) + b2_ref[...]
    h = _leaky_relu(h)

    # conv3: A @ (H @ W3)   (transform first: F_out=2 < F_in=3)
    s = jnp.dot(h, w3_ref[...], preferred_element_type=jnp.float32)
    h = jnp.dot(a, s.astype(jnp.bfloat16),
                preferred_element_type=jnp.float32) + b3_ref[...]

    o_ref[...] = h.astype(o_ref.dtype)


def _gcn_forward_fused(a_hat_bf16, x, params):
    w1, b1, w2, b2, w3, b3 = params
    n = x.shape[0]
    vmem = pl.BlockSpec(memory_space=pltpu.MemorySpace.VMEM)
    return pl.pallas_call(
        _gcn_fused_kernel,
        out_shape=jax.ShapeDtypeStruct((n, w3.shape[1]), jnp.float32),
        in_specs=[vmem] * 8,
        out_specs=vmem,
    )(a_hat_bf16, x, w1, b1.reshape(1, -1), w2, b2.reshape(1, -1),
      w3, b3.reshape(1, -1))


# ---------------------------------------------------------------------------
# Tiled per-layer kernel (large graphs): A_hat tiled (tm, tk), k-reduction axis
# ---------------------------------------------------------------------------
def _make_layer_kernel(transform_after, apply_act):
    """out[i] = act?( (sum_k A[i,k] @ S[k]) [@ W] + b )

    transform_after=True : S = H        (accumulate with width F_in, apply W at end)
    transform_after=False: S = H @ W    (accumulate with width F_out)
    The narrower of the two widths is always chosen by the caller.
    """
    def kernel(a_ref, h_ref, w_ref, b_ref, o_ref, acc_ref):
        @pl.when(pl.program_id(1) == 0)
        def _init():
            acc_ref[...] = jnp.zeros_like(acc_ref)

        a = a_ref[...]                                       # (tm, tk) bf16
        if transform_after:
            s = h_ref[...]                                   # (tk, f_in) f32
        else:
            s = jnp.dot(h_ref[...], w_ref[...],              # (tk, f_out) f32
                        preferred_element_type=jnp.float32)
        acc_ref[...] += jnp.dot(a, s.astype(jnp.bfloat16),
                                preferred_element_type=jnp.float32)

        @pl.when(pl.program_id(1) == pl.num_programs(1) - 1)
        def _finalize():
            r = acc_ref[...]
            if transform_after:
                r = jnp.dot(r, w_ref[...], preferred_element_type=jnp.float32)
            r = r + b_ref[...]
            if apply_act:
                r = _leaky_relu(r)
            o_ref[...] = r.astype(o_ref.dtype)

    return kernel


def _gcn_layer_tiled(a_bf16, h, w, b, apply_act, tm, tk):
    n_pad = a_bf16.shape[0]
    f_in, f_out = w.shape
    transform_after = f_in <= f_out          # accumulate in the narrower width
    acc_width = f_in if transform_after else f_out
    grid = (n_pad // tm, n_pad // tk)        # rows "parallel", reduction axis last

    return pl.pallas_call(
        _make_layer_kernel(transform_after, apply_act),
        out_shape=jax.ShapeDtypeStruct((n_pad, f_out), jnp.float32),
        grid_spec=pltpu.PrefetchScalarGridSpec(
            num_scalar_prefetch=0,
            grid=grid,
            in_specs=[
                pl.BlockSpec((tm, tk), lambda i, k: (i, k)),       # A_hat tile
                pl.BlockSpec((tk, f_in), lambda i, k: (k, 0)),     # H rows of k tile
                pl.BlockSpec((f_in, f_out), lambda i, k: (0, 0)),  # W (resident)
                pl.BlockSpec((1, f_out), lambda i, k: (0, 0)),     # b (resident)
            ],
            out_specs=pl.BlockSpec((tm, f_out), lambda i, k: (i, 0)),
            scratch_shapes=[pltpu.VMEM((tm, acc_width), jnp.float32)],
        ),
        compiler_params=pltpu.CompilerParams(
            dimension_semantics=("parallel", "arbitrary")),
    )(a_bf16, h, w, b.reshape(1, -1))


def _gcn_forward_tiled(a_hat_bf16, x, params, tm, tk):
    n = x.shape[0]
    w1, b1, w2, b2, w3, b3 = params

    # (8, 128)-aligned tiles; pad N so both tile sizes divide it.  Zero padding is
    # exact: padded A_hat columns contribute nothing to any aggregation, and padded
    # output rows are sliced off.
    tm = _round_up(max(8, min(tm, 512)), 8)
    tk = _round_up(max(128, min(tk, 2048)), 128)
    n_pad = _round_up(n, math.lcm(tm, tk))
    if n_pad != n:
        a_hat_bf16 = jnp.pad(a_hat_bf16, ((0, n_pad - n), (0, n_pad - n)))
        x = jnp.pad(x, ((0, n_pad - n), (0, 0)))

    h = _gcn_layer_tiled(a_hat_bf16, x, w1, b1, True, tm, tk)    # conv1 + leaky
    h = _gcn_layer_tiled(a_hat_bf16, h, w2, b2, True, tm, tk)    # conv2 + leaky
    out = _gcn_layer_tiled(a_hat_bf16, h, w3, b3, False, tm, tk) # conv3
    return out[:n]


# ---------------------------------------------------------------------------
# Plain-JAX glue (adjacency normalization) and public entry point
# ---------------------------------------------------------------------------
def build_normalized_adjacency(edge_index, num_nodes):
    """Dense gcn_norm: D^{-1/2} (A + I) D^{-1/2}, unit edge weights."""
    # TODO(synk): the scatter-add adjacency construction has no clean Pallas
    # equivalent (data-dependent scatter); it stays in plain-JAX glue.
    src, dst = edge_index[0], edge_index[1]
    a = jnp.zeros((num_nodes, num_nodes), jnp.float32).at[dst, src].add(1.0)
    a = a + jnp.eye(num_nodes, dtype=jnp.float32)          # self loops (PyG-style)
    deg = a.sum(axis=1)
    dinv = jnp.where(deg > 0, 1.0 / jnp.sqrt(deg), 0.0)
    return a * dinv[:, None] * dinv[None, :]


def gcn_forward(x, edge_index, params, *, tm=512, tk=1024, use_tiled=None):
    n = x.shape[0]
    x = x.astype(jnp.float32)
    # A_hat streamed as bf16 (halves HBM traffic); accumulation stays f32 in-kernel.
    a_hat = build_normalized_adjacency(edge_index, n).astype(jnp.bfloat16)
    if use_tiled is None:
        use_tiled = n > _SMALL_N
    if use_tiled:
        return _gcn_forward_tiled(a_hat, x, params, tm, tk)
    return _gcn_forward_fused(a_hat, x, params)


def gcn_reference(x, edge_index, params):
    """Plain-JAX f32 reference with the canonical GCNConv evaluation order."""
    a = build_normalized_adjacency(edge_index, x.shape[0])
    w1, b1, w2, b2, w3, b3 = params
    h = _leaky_relu(a @ (x.astype(jnp.float32) @ w1) + b1)
    h = _leaky_relu(a @ (h @ w2) + b2)
    return a @ (h @ w3) + b3


def init_params(key, num_node_features=3):
    """Deterministic glorot-uniform weights, zero biases (PyG GCNConv defaults)."""
    def glorot(k, shape):
        fan_in, fan_out = shape
        limit = jnp.sqrt(6.0 / (fan_in + fan_out))
        return jax.random.uniform(k, shape, jnp.float32, -limit, limit)

    k1, k2, k3 = jax.random.split(key, 3)
    w1 = glorot(k1, (num_node_features, 8))
    b1 = jnp.zeros((8,), jnp.float32)
    w2 = glorot(k2, (8, num_node_features))
    b2 = jnp.zeros((num_node_features,), jnp.float32)
    w3 = glorot(k3, (num_node_features, 2))
    b3 = jnp.zeros((2,), jnp.float32)
    return (w1, b1, w2, b2, w3, b3)


def ring_edge_index(n):
    """Deterministic bidirectional ring graph: i <-> (i+1) % n."""
    idx = jnp.arange(n, dtype=jnp.int32)
    nxt = (idx + 1) % n
    return jnp.stack([jnp.concatenate([idx, nxt]),
                      jnp.concatenate([nxt, idx])], axis=0)   # (2, 2n)


if __name__ == "__main__":
    key = jax.random.PRNGKey(0)
    k_x1, k_x2, k_p = jax.random.split(key, 3)

    num_node_features = 3
    params = init_params(k_p, num_node_features)

    # Tolerances cover bf16-A_hat rounding (~1% typical, values are O(1)).
    RTOL, ATOL = 1e-1, 1e-1

    # --- test 1: module-scale graph (N=16) -> fused single-block kernel path ---
    n_small = 16
    x_s = jax.random.normal(k_x1, (n_small, num_node_features), jnp.float32)
    ei_s = ring_edge_index(n_small)
    out_s = jax.block_until_ready(gcn_forward(x_s, ei_s, params))
    ref_s = gcn_reference(x_s, ei_s, params)
    assert out_s.shape == (n_small, 2) and out_s.dtype == jnp.float32
    assert bool(jnp.allclose(out_s, ref_s, rtol=RTOL, atol=ATOL))

    # --- test 2: larger graph -> tiled / pipelined path (multi-step k reduction) ---
    n_big = 1024
    x_b = jax.random.normal(k_x2, (n_big, num_node_features), jnp.float32)
    ei_b = ring_edge_index(n_big)
    out_b = jax.block_until_ready(
        gcn_forward(x_b, ei_b, params, tm=256, tk=512, use_tiled=True))
    ref_b = gcn_reference(x_b, ei_b, params)
    assert out_b.shape == (n_big, 2) and out_b.dtype == jnp.float32
    assert bool(jnp.allclose(out_b, ref_b, rtol=RTOL, atol=ATOL))

    print("KERNEL_OK")
</pallas_src>

<mosaic_0001>
module attributes {stable_mosaic.version = 11 : i64} {
  func.func @_gcn_fused_kernel(%arg0: memref<16x16xbf16, #tpu.memory_space<vmem>>, %arg1: memref<16x3xf32, #tpu.memory_space<vmem>>, %arg2: memref<3x8xf32, #tpu.memory_space<vmem>>, %arg3: memref<1x8xf32, #tpu.memory_space<vmem>>, %arg4: memref<8x3xf32, #tpu.memory_space<vmem>>, %arg5: memref<1x3xf32, #tpu.memory_space<vmem>>, %arg6: memref<3x2xf32, #tpu.memory_space<vmem>>, %arg7: memref<1x2xf32, #tpu.memory_space<vmem>>, %arg8: memref<16x2xf32, #tpu.memory_space<vmem>>) attributes {dimension_semantics = [], scalar_prefetch = 0 : i64, scratch_operands = 0 : i64, tpu.core_type = #tpu.core_type<tc>} {
    %c0 = arith.constant 0 : index
    %c0_0 = arith.constant 0 : index
    %0 = vector.load %arg0[%c0, %c0_0] : memref<16x16xbf16, #tpu.memory_space<vmem>>, vector<16x16xbf16>
    %c0_1 = arith.constant 0 : index
    %c0_2 = arith.constant 0 : index
    %1 = vector.load %arg1[%c0_1, %c0_2] : memref<16x3xf32, #tpu.memory_space<vmem>>, vector<16x3xf32>
    %2 = arith.truncf %1 : vector<16x3xf32> to vector<16x3xbf16>
    %cst = arith.constant dense<0.000000e+00> : vector<16x3xf32>
    %3 = tpu.matmul %0, %2, %cst {dimension_numbers = #tpu.dot_dimension_numbers<[1], [0], [0], [1], [0, 0, 1, 1], [], []>} : vector<16x16xbf16>, vector<16x3xbf16>, vector<16x3xf32> -> vector<16x3xf32>
    %c0_3 = arith.constant 0 : index
    %c0_4 = arith.constant 0 : index
    %4 = vector.load %arg2[%c0_3, %c0_4] : memref<3x8xf32, #tpu.memory_space<vmem>>, vector<3x8xf32>
    %cst_5 = arith.constant dense<0.000000e+00> : vector<16x8xf32>
    %5 = tpu.matmul %3, %4, %cst_5 {dimension_numbers = #tpu.dot_dimension_numbers<[1], [0], [0], [1], [0, 0, 1, 1], [], []>} : vector<16x3xf32>, vector<3x8xf32>, vector<16x8xf32> -> vector<16x8xf32>
    %c0_6 = arith.constant 0 : index
    %c0_7 = arith.constant 0 : index
    %6 = vector.load %arg3[%c0_6, %c0_7] : memref<1x8xf32, #tpu.memory_space<vmem>>, vector<1x8xf32>
    %7 = vector.broadcast %6 : vector<1x8xf32> to vector<16x8xf32>
    %8 = arith.addf %5, %7 : vector<16x8xf32>
    %cst_8 = arith.constant 0.000000e+00 : f32
    %9 = vector.broadcast %cst_8 : f32 to vector<16x8xf32>
    %10 = arith.cmpf ogt, %8, %9 : vector<16x8xf32>
    %cst_9 = arith.constant 0.00999999977 : f32
    %11 = vector.broadcast %cst_9 : f32 to vector<16x8xf32>
    %12 = arith.mulf %11, %8 : vector<16x8xf32>
    %13 = arith.select %10, %8, %12 : vector<16x8xi1>, vector<16x8xf32>
    %c0_10 = arith.constant 0 : index
    %c0_11 = arith.constant 0 : index
    %14 = vector.load %arg4[%c0_10, %c0_11] : memref<8x3xf32, #tpu.memory_space<vmem>>, vector<8x3xf32>
    %cst_12 = arith.constant dense<0.000000e+00> : vector<16x3xf32>
    %15 = tpu.matmul %13, %14, %cst_12 {dimension_numbers = #tpu.dot_dimension_numbers<[1], [0], [0], [1], [0, 0, 1, 1], [], []>} : vector<16x8xf32>, vector<8x3xf32>, vector<16x3xf32> -> vector<16x3xf32>
    %16 = arith.truncf %15 : vector<16x3xf32> to vector<16x3xbf16>
    %cst_13 = arith.constant dense<0.000000e+00> : vector<16x3xf32>
    %17 = tpu.matmul %0, %16, %cst_13 {dimension_numbers = #tpu.dot_dimension_numbers<[1], [0], [0], [1], [0, 0, 1, 1], [], []>} : vector<16x16xbf16>, vector<16x3xbf16>, vector<16x3xf32> -> vector<16x3xf32>
    %c0_14 = arith.constant 0 : index
    %c0_15 = arith.constant 0 : index
    %18 = vector.load %arg5[%c0_14, %c0_15] : memref<1x3xf32, #tpu.memory_space<vmem>>, vector<1x3xf32>
    %19 = vector.broadcast %18 : vector<1x3xf32> to vector<16x3xf32>
    %20 = arith.addf %17, %19 : vector<16x3xf32>
    %cst_16 = arith.constant 0.000000e+00 : f32
    %21 = vector.broadcast %cst_16 : f32 to vector<16x3xf32>
    %22 = arith.cmpf ogt, %20, %21 : vector<16x3xf32>
    %cst_17 = arith.constant 0.00999999977 : f32
    %23 = vector.broadcast %cst_17 : f32 to vector<16x3xf32>
    %24 = arith.mulf %23, %20 : vector<16x3xf32>
    %25 = arith.select %22, %20, %24 : vector<16x3xi1>, vector<16x3xf32>
    %c0_18 = arith.constant 0 : index
    %c0_19 = arith.constant 0 : index
    %26 = vector.load %arg6[%c0_18, %c0_19] : memref<3x2xf32, #tpu.memory_space<vmem>>, vector<3x2xf32>
    %cst_20 = arith.constant dense<0.000000e+00> : vector<16x2xf32>
    %27 = tpu.matmul %25, %26, %cst_20 {dimension_numbers = #tpu.dot_dimension_numbers<[1], [0], [0], [1], [0, 0, 1, 1], [], []>} : vector<16x3xf32>, vector<3x2xf32>, vector<16x2xf32> -> vector<16x2xf32>
    %28 = arith.truncf %27 : vector<16x2xf32> to vector<16x2xbf16>
    %cst_21 = arith.constant dense<0.000000e+00> : vector<16x2xf32>
    %29 = tpu.matmul %0, %28, %cst_21 {dimension_numbers = #tpu.dot_dimension_numbers<[1], [0], [0], [1], [0, 0, 1, 1], [], []>} : vector<16x16xbf16>, vector<16x2xbf16>, vector<16x2xf32> -> vector<16x2xf32>
    %c0_22 = arith.constant 0 : index
    %c0_23 = arith.constant 0 : index
    %30 = vector.load %arg7[%c0_22, %c0_23] : memref<1x2xf32, #tpu.memory_space<vmem>>, vector<1x2xf32>
    %31 = vector.broadcast %30 : vector<1x2xf32> to vector<16x2xf32>
    %32 = arith.addf %29, %31 : vector<16x2xf32>
    %c0_24 = arith.constant 0 : index
    %c0_25 = arith.constant 0 : index
    %33 = vector.load %arg8[%c0_24, %c0_25] : memref<16x2xf32, #tpu.memory_space<vmem>>, vector<16x2xf32>
    tpu.vector_store %arg8[%c0_24, %c0_25], %32 {strides = array<i32>} : memref<16x2xf32, #tpu.memory_space<vmem>>, vector<16x2xf32>,
    return
  }
}

</mosaic_0001>

<bundles_post_ra>
// kernel: tpu_custom_call.1
= control target key start
LH: loop header
LB: loop body
LE: loop exit
PB: predicated region body
PF: predicated region fallthrough
CT: control target
= control target key end

     0   :  { %v530_v0 = vmov 0.0   ;;  %vm531_vm0 = vmmov 0   ;;  %vm40_vm1 = vcmask 130048   ;;  %vm100_vm2 = vcmask 1042432   ;;  %s629_s1 = inlined_call_operand.vmem [shape: f32[16,3], index: 1, kind: input, shape index: {}]   ;;  %s630_s0 = inlined_call_operand.vmem [shape: bf16[16,16], index: 0, kind: input, shape index: {}]   ;;  %s631_s2 = inlined_call_operand.vmem [shape: f32[3,8], index: 2, kind: input, shape index: {}]   ;;  %s632_s4 = inlined_call_operand.vmem [shape: f32[8,3], index: 4, kind: input, shape index: {}]   ;;  %s633_s3 = inlined_call_operand.vmem [shape: f32[1,8], index: 3, kind: input, shape index: {}]   ;;  %s634_s6 = inlined_call_operand.vmem [shape: f32[3,2], index: 6, kind: input, shape index: {}]   ;;  %s635_s5 = inlined_call_operand.vmem [shape: f32[1,3], index: 5, kind: input, shape index: {}]   ;;  %s636_s7 = inlined_call_operand.vmem [shape: f32[1,2], index: 7, kind: input, shape index: {}]   ;;  %s637_s8 = inlined_call_operand.vmem [shape: f32[16,2], index: 8, kind: output, shape index: {}]  }
   0x1   :  { %494 = vmatprep.subr.bf16.mxu0 %v530_v0  ;;  %v32_v1 = vld [vmem:[%s629_s1] sm:$0xff]  ;;  %v33_v2 = vld [vmem:[%s629_s1 + $0x8] sm:$0xff]  ;;  %496 = vmatprep.mubr.msk.bf16.mxu0 %vm531_vm0, %v530_v0  ;;  %vm93_vm3 = vcmask 23552   ;;  %vm186_vm6 = vcmask 64512   ;;  %vm457_vm9 = vcmask 15360  }
   0x2   :  { %v34_v3 = vpack.c.bf16 %v33_v2, %v32_v1  ;;  %v587_v4 = vld [vmem:[%s630_s0] sm:$0xff]  }
   0x3   :  { %v85_v5 = vld [vmem:[%s631_s2] sm:$0x7] }
   0x4   :  { %495 = vmatpush3.bf16.msra.mxu0 %v34_v3  ;;  %500 = vmatprep.subr.msk.mxu1 %vm100_vm2, %v85_v5  ;;  %v185_v10 = vld [vmem:[%s632_s4] sm:$0xff] }
   0x5   :  { %521 = vmatprep.subr.bf16.mxu0 %v530_v0  ;;  %501 = vmatpush3.msk.msra.mxu1 %vm100_vm2, %v85_v5  ;;  %v466_v11 = vld [vmem:[%s633_s3] ss:$0 sm:$0xff] }
   0x6   :  { %505 = vmatprep.subr.mxu1 %v185_v10  ;;  %v323_v23 = vld [vmem:[%s634_s6] sm:$0x7] }
   0x7   :  { %497 = vmatmul.mubr.msk.bf16.vlgmr.msra.gmra.mxu0 %vm40_vm1, %v587_v4  ;;  %v472_v24 = vld [vmem:[%s635_s5] ss:$0 sm:$0xff] }
   0x8   :  { %523 = vmatprep.mubr.msk.bf16.mxu0 %vm531_vm0, %v530_v0  ;;  %v477_v38 = vld [vmem:[%s636_s7] ss:$0 sm:$0xff] }
  0xc7   :  { %v78_v6 = vpop.f32.mrf.mxu0 }
  0xc8   :  { %502 = vmatprep.mubr.msk.f32.mxu1 %vm93_vm3, %v78_v6 }
  0xc9   :  { %v498_v7 = vpop.f32.mrf.mxu0 }
  0xcb   :  { %v81_v8 = vpop.f32.mrf.mxu0 }
  0xcc   :  { %503 = vmatmul.mubr.msk.f32.vlgmr.msra.gmra.mxu1 %vm93_vm3, %v81_v8 }
  0xcd   :  { %v499_v9 = vpop.f32.mrf.mxu0  ;;  %506 = vmatpush3.msra.mxu1 %v185_v10 }
  0xce   :  { %510 = vmatprep.subr.bf16.mxu1 %v530_v0 }
 0x18c   :  { %v504_v12 = vpop.f32.mrf.mxu1 }
 0x18d   :  { %v176_v13 = vadd.f32 %v504_v12, %v466_v11 }
 0x18e   :  { %v170_v14 = vpop.f32.mrf.mxu1 }
 0x18f   :  { %v171_v15 = vadd.f32 %v466_v11, %v170_v14  ;;  %v182_v16 = vmul.f32 0.01, %v176_v13  ;;  %vm180_vm4 = vcmp.gt.f32.partialorder %v176_v13, 0.0 }
 0x191   :  { %vm179_vm5 = vcmp.gt.f32.partialorder %v171_v15, 0.0  ;;  %v181_v17 = vmul.f32 0.01, %v171_v15  ;;  %v184_v19 = vsel %vm180_vm4, %v176_v13, %v182_v16 }
 0x193   :  { %v183_v18 = vsel %vm179_vm5, %v171_v15, %v181_v17 }
 0x194   :  { %507 = vmatprep.mubr.msk.f32.mxu1 %vm186_vm6, %v183_v18 }
 0x195   :  { %508 = vmatmul.mubr.msk.f32.vlgmr.msra.gmra.mxu1 %vm186_vm6, %v184_v19 }
 0x196   :  { %512 = vmatprep.mubr.msk.bf16.mxu1 %vm531_vm0, %v530_v0 }
 0x255   :  { %v509_v20 = vpop.f32.mrf.mxu1 }
 0x257   :  { %v259_v21 = vpop.f32.mrf.mxu1 }
 0x258   :  { %v268_v22 = vpack.c.bf16 %v509_v20, %v259_v21 }
 0x25a   :  { %511 = vmatpush3.bf16.msra.mxu1 %v268_v22 }
 0x25b   :  { %516 = vmatprep.subr.msk.mxu1 %vm100_vm2, %v323_v23 }
 0x25d   :  { %513 = vmatmul.mubr.msk.bf16.vlgmr.msra.gmra.mxu1 %vm40_vm1, %v587_v4 }
 0x25e   :  { %517 = vmatpush3.msk.msra.mxu1 %vm100_vm2, %v323_v23 }
 0x31d   :  { %v310_v25 = vpop.f32.mrf.mxu1 }
 0x31e   :  { %v311_v26 = vadd.f32 %v472_v24, %v310_v25 }
 0x31f   :  { %v514_v27 = vpop.f32.mrf.mxu1 }
 0x320   :  { %vm317_vm7 = vcmp.gt.f32.partialorder %v311_v26, 0.0  ;;  %v319_v28 = vmul.f32 0.01, %v311_v26 }
 0x321   :  { %v313_v29 = vpop.f32.mrf.mxu1 }
 0x322   :  { %v314_v30 = vadd.f32 %v472_v24, %v313_v29  ;;  %v321_v31 = vsel %vm317_vm7, %v311_v26, %v319_v28 }
 0x323   :  { %v515_v32 = vpop.f32.mrf.mxu1  ;;  %518 = vmatprep.mubr.msk.f32.mxu1 %vm93_vm3, %v321_v31 }
 0x324   :  { %vm318_vm8 = vcmp.gt.f32.partialorder %v314_v30, 0.0  ;;  %v320_v33 = vmul.f32 0.01, %v314_v30 }
 0x326   :  { %v322_v34 = vsel %vm318_vm8, %v314_v30, %v320_v33 }
 0x327   :  { %519 = vmatmul.mubr.msk.f32.vlgmr.msra.gmra.mxu1 %vm93_vm3, %v322_v34 }
 0x3e7   :  { %v520_v35 = vpop.f32.mrf.mxu1 }
 0x3e9   :  { %v399_v36 = vpop.f32.mrf.mxu1 }
 0x3ea   :  { %v408_v37 = vpack.c.bf16 %v520_v35, %v399_v36 }
 0x3ec   :  { %522 = vmatpush3.bf16.msra.mxu0 %v408_v37 }
 0x3ef   :  { %524 = vmatmul.mubr.msk.bf16.vlgmr.msra.gmra.mxu0 %vm40_vm1, %v587_v4 }
 0x4af   :  { %v450_v39 = vpop.f32.mrf.mxu0 }
 0x4b0   :  { %v451_v40 = vadd.f32 %v477_v38, %v450_v39 }
 0x4b1   :  { %v525_v41 = vpop.f32.mrf.mxu0 }
 0x4b2   :  { %458 = vst.msk [vmem:[%s637_s8] sm:$0xff] %vm457_vm9, %v451_v40 }
 0x4b3   :  { %v453_v42 = vpop.f32.mrf.mxu0 }
 0x4b4   :  { %v454_v43 = vadd.f32 %v477_v38, %v453_v42 }
 0x4b5   :  { %v526_v44 = vpop.f32.mrf.mxu0 }
 0x4b6   :  { %459 = vst.msk [vmem:[%s637_s8 + $0x8] sm:$0xff] %vm457_vm9, %v454_v43 }

</bundles_post_ra>
